<compile_context>
chip_gen: v7x
topology: tpu7x:2x2x1
jax: 0.10.0
libtpu: 0.0.40
codegen_flags: <defaults>
</compile_context>

<pallas_src>
import jax
import jax.numpy as jnp
from jax.experimental import pallas as pl
from jax.experimental.pallas import tpu as pltpu

# ---- small, module-consistent shapes ---------------------------------------
N, H, W = 2, 16, 16          # batch, spatial
CIN = 3                      # RGB input
NUM_FILTERS = 8              # kwargs['num_filters']
FEAT_CH = 16                 # synthetic model_out_channels
NUM_CLASSES = 4              # num_classes
K7, K3, PAD = 7, 3, 3
HP, WP = H + 2 * PAD, W + 2 * PAD
HW = H * W
NPIX = N * HW
EPS = 1e-8


def _grid_n():
    """2-way parallel grid on dual-TC v7x; fold the batch on single-TC v5e/v6e."""
    try:
        kind = jax.devices()[0].device_kind.lower()
    except Exception:
        kind = ""
    return N if ("v7" in kind or "7x" in kind) else 1


GRID_N = _grid_n()
LB = NPIX // GRID_N          # pixels (lanes) handled per grid step


def cnet_kernel(xpat7_ref, xpat3_ref, w7t_ref, b7_ref, w3t_ref, b3_ref,
                woutt_ref, bout_ref, o_ref):
    # xpat7_ref: (CIN, 49, LB)  per-channel 7x7 im2col patches (pixels on lanes)
    # xpat3_ref: (27, LB)       3x3 im2col patches (tap*CIN + c on sublanes)
    # o_ref:     (NB, NUM_CLASSES, HW)  lane-dense output (NB images this step)

    # ---- custom layer: HSV saturation, computed per (pixel, tap) slab.
    # Channel max/min = 2x elementwise max/min of the 3 channel slabs (pure VPU);
    # divide done via EUP reciprocal + multiply.
    c0 = xpat7_ref[0]
    c1 = xpat7_ref[1]
    c2 = xpat7_ref[2]
    mx = jnp.maximum(jnp.maximum(c0, c1), c2)
    mn = jnp.minimum(jnp.minimum(c0, c1), c2)
    sat = (mx - mn) * pl.reciprocal(mx + EPS, approx=False)      # (49, LB)

    # ---- self.filter: Conv2d(1, F, k=7, pad=3) + ReLU -> ONE MXU matmul.
    filt = jnp.maximum(
        jnp.dot(w7t_ref[...], sat, preferred_element_type=jnp.float32)
        + b7_ref[...], 0.0)                                      # (F, LB)

    # ---- synthetic backbone: Conv2d(3, FEAT_CH, k=3, pad=1) + ReLU -> ONE matmul.
    feat = jnp.maximum(
        jnp.dot(w3t_ref[...], xpat3_ref[...], preferred_element_type=jnp.float32)
        + b3_ref[...], 0.0)                                      # (FEAT_CH, LB)

    # ---- self.out: 1x1 conv on cat([feat, filt]) -> single merged matmul.
    cat = jnp.concatenate([feat, filt], axis=0)                  # (FEAT_CH+F, LB)
    out = (jnp.dot(woutt_ref[...], cat, preferred_element_type=jnp.float32)
           + bout_ref[...])                                      # (NUM_CLASSES, LB)

    nb = o_ref.shape[0]                                          # 1 or 2 (static)
    for bi in range(nb):
        o_ref[bi] = out[:, bi * HW:(bi + 1) * HW]                # lane-dense stores


def init_params(key):
    ks = jax.random.split(key, 7)
    w7 = jax.random.normal(ks[0], (K7 * K7, NUM_FILTERS), jnp.float32) * 0.1
    b7 = jax.random.normal(ks[1], (1, NUM_FILTERS), jnp.float32) * 0.01
    w3 = jax.random.normal(ks[2], (K3 * K3, CIN, FEAT_CH), jnp.float32) * 0.1
    b3 = jax.random.normal(ks[3], (1, FEAT_CH), jnp.float32) * 0.01
    wout_feat = jax.random.normal(ks[4], (FEAT_CH, NUM_CLASSES), jnp.float32) * 0.1
    wout_sat = jax.random.normal(ks[5], (NUM_FILTERS, NUM_CLASSES), jnp.float32) * 0.1
    bout = jax.random.normal(ks[6], (1, NUM_CLASSES), jnp.float32) * 0.01
    return (w7, b7, w3, b3, wout_feat, wout_sat, bout)


def _im2col(xp):
    """xp: (N, CIN, HP, WP) zero-padded input -> lane-dense patch matrices."""
    # 7x7 patches, per channel, batch folded into the lane dim: (CIN, 49, N*HW)
    p7 = [xp[:, :, dh:dh + H, dw:dw + W] for dh in range(K7) for dw in range(K7)]
    xpat7 = jnp.stack(p7, axis=2).reshape(N, CIN, K7 * K7, HW)
    xpat7 = jnp.transpose(xpat7, (1, 2, 0, 3)).reshape(CIN, K7 * K7, NPIX)
    # 3x3 patches (effective pad=1), tap-major/channel-minor rows: (27, N*HW)
    p3 = [xp[:, :, 2 + dh:2 + dh + H, 2 + dw:2 + dw + W]
          for dh in range(K3) for dw in range(K3)]
    xpat3 = jnp.stack(p3, axis=1).reshape(N, K3 * K3 * CIN, HW)
    xpat3 = jnp.transpose(xpat3, (1, 0, 2)).reshape(K3 * K3 * CIN, NPIX)
    return xpat7, xpat3


@jax.jit
def cnet_forward(x_nchw, params):
    w7, b7, w3, b3, wout_feat, wout_sat, bout = params
    x = x_nchw.astype(jnp.float32)                               # stays NCHW
    xp = jnp.pad(x, ((0, 0), (0, 0), (PAD, PAD), (PAD, PAD)))    # (N, 3, HP, WP)
    xpat7, xpat3 = _im2col(xp)

    # Parameter-only re-layouts (channels/classes on sublanes).
    w7t = w7.T                                                   # (F, 49)
    b7t = b7.T                                                   # (F, 1)
    w3t = w3.reshape(K3 * K3 * CIN, FEAT_CH).T                   # (FEAT_CH, 27)
    b3t = b3.T                                                   # (FEAT_CH, 1)
    woutt = jnp.concatenate([wout_feat, wout_sat], axis=0).T     # (C, FEAT_CH+F)
    boutt = bout.T                                               # (C, 1)

    out = pl.pallas_call(
        cnet_kernel,
        out_shape=jax.ShapeDtypeStruct((N, NUM_CLASSES, HW), jnp.float32),
        grid=(GRID_N,),
        in_specs=[
            pl.BlockSpec((CIN, K7 * K7, LB), lambda i: (0, 0, i)),
            pl.BlockSpec((K3 * K3 * CIN, LB), lambda i: (0, i)),
            pl.BlockSpec((NUM_FILTERS, K7 * K7), lambda i: (0, 0)),
            pl.BlockSpec((NUM_FILTERS, 1), lambda i: (0, 0)),
            pl.BlockSpec((FEAT_CH, K3 * K3 * CIN), lambda i: (0, 0)),
            pl.BlockSpec((FEAT_CH, 1), lambda i: (0, 0)),
            pl.BlockSpec((NUM_CLASSES, FEAT_CH + NUM_FILTERS), lambda i: (0, 0)),
            pl.BlockSpec((NUM_CLASSES, 1), lambda i: (0, 0)),
        ],
        out_specs=pl.BlockSpec((N // GRID_N, NUM_CLASSES, HW), lambda i: (i, 0, 0)),
        compiler_params=pltpu.CompilerParams(dimension_semantics=("parallel",)),
    )(xpat7, xpat3, w7t, b7t, w3t, b3t, woutt, boutt)

    return out.reshape(N, NUM_CLASSES, H, W)                     # already NCHW


def cnet_ref(x_nchw, params):
    """Pure-JAX reference mirroring the PyTorch forward semantics."""
    w7, b7, w3, b3, wout_feat, wout_sat, bout = params
    x = jnp.transpose(x_nchw, (0, 2, 3, 1)).astype(jnp.float32)
    xp = jnp.pad(x, ((0, 0), (PAD, PAD), (PAD, PAD), (0, 0)))
    mx = jnp.max(xp, axis=-1, keepdims=True)
    mn = jnp.min(xp, axis=-1, keepdims=True)
    sat = (mx - mn) / (mx + EPS)
    filt = jnp.zeros((N, H, W, NUM_FILTERS), jnp.float32)
    for dh in range(K7):
        for dw in range(K7):
            filt = filt + sat[:, dh:dh + H, dw:dw + W, :] * w7[dh * K7 + dw]
    filt = jnp.maximum(filt + b7[0], 0.0)
    feat = jnp.zeros((N, H, W, FEAT_CH), jnp.float32)
    for dh in range(K3):
        for dw in range(K3):
            feat = feat + jnp.einsum('nhwc,cf->nhwf',
                                     xp[:, 2 + dh:2 + dh + H, 2 + dw:2 + dw + W, :],
                                     w3[dh * K3 + dw], precision='highest')
    feat = jnp.maximum(feat + b3[0], 0.0)
    out = (jnp.einsum('nhwc,ck->nhwk', feat, wout_feat, precision='highest')
           + jnp.einsum('nhwc,ck->nhwk', filt, wout_sat, precision='highest')
           + bout[0])
    return jnp.transpose(out, (0, 3, 1, 2))


if __name__ == "__main__":
    key = jax.random.PRNGKey(0)
    kx, kp = jax.random.split(key)
    x = jax.random.uniform(kx, (N, CIN, H, W), jnp.float32)       # NCHW, like PyTorch
    params = init_params(kp)

    out = cnet_forward(x, params)
    out = jax.block_until_ready(out)

    assert out.shape == (N, NUM_CLASSES, H, W), out.shape
    ref = cnet_ref(x, params)
    max_err = float(jnp.max(jnp.abs(out - ref)))
    assert max_err < 2e-3, f"mismatch vs reference: {max_err}"

    print("KERNEL_OK")
</pallas_src>

<mosaic_0001>
module attributes {stable_mosaic.version = 11 : i64} {
  func.func @cnet_kernel(%arg0: i32, %arg1: memref<3x49x512xf32, #tpu.memory_space<vmem>>, %arg2: memref<27x512xf32, #tpu.memory_space<vmem>>, %arg3: memref<8x49xf32, #tpu.memory_space<vmem>>, %arg4: memref<8x1xf32, #tpu.memory_space<vmem>>, %arg5: memref<16x27xf32, #tpu.memory_space<vmem>>, %arg6: memref<16x1xf32, #tpu.memory_space<vmem>>, %arg7: memref<4x24xf32, #tpu.memory_space<vmem>>, %arg8: memref<4x1xf32, #tpu.memory_space<vmem>>, %arg9: memref<2x4x256xf32, #tpu.memory_space<vmem>>) attributes {dimension_semantics = [#tpu.dimension_semantics<parallel>], iteration_bounds = array<i64: 1>, scalar_prefetch = 0 : i64, scratch_operands = 0 : i64, tpu.core_type = #tpu.core_type<tc>, window_params = [{transform_indices = @transform_0, window_bounds = array<i64: 3, 49, 512>}, {transform_indices = @transform_1, window_bounds = array<i64: 27, 512>}, {pipeline_mode = #tpu.pipeline_mode<synchronous>, transform_indices = @transform_2, window_bounds = array<i64: 8, 49>}, {pipeline_mode = #tpu.pipeline_mode<synchronous>, transform_indices = @transform_3, window_bounds = array<i64: 8, 1>}, {pipeline_mode = #tpu.pipeline_mode<synchronous>, transform_indices = @transform_4, window_bounds = array<i64: 16, 27>}, {pipeline_mode = #tpu.pipeline_mode<synchronous>, transform_indices = @transform_5, window_bounds = array<i64: 16, 1>}, {pipeline_mode = #tpu.pipeline_mode<synchronous>, transform_indices = @transform_6, window_bounds = array<i64: 4, 24>}, {pipeline_mode = #tpu.pipeline_mode<synchronous>, transform_indices = @transform_7, window_bounds = array<i64: 4, 1>}, {transform_indices = @transform_8, window_bounds = array<i64: 2, 4, 256>}]} {
    %c0 = arith.constant 0 : index
    %c0_0 = arith.constant 0 : index
    %c0_1 = arith.constant 0 : index
    %0 = vector.load %arg1[%c0, %c0_0, %c0_1] : memref<3x49x512xf32, #tpu.memory_space<vmem>>, vector<1x49x512xf32>
    %1 = vector.shape_cast %0 : vector<1x49x512xf32> to vector<49x512xf32>
    %c1 = arith.constant 1 : index
    %c0_2 = arith.constant 0 : index
    %c0_3 = arith.constant 0 : index
    %2 = vector.load %arg1[%c1, %c0_2, %c0_3] : memref<3x49x512xf32, #tpu.memory_space<vmem>>, vector<1x49x512xf32>
    %3 = vector.shape_cast %2 : vector<1x49x512xf32> to vector<49x512xf32>
    %c2 = arith.constant 2 : index
    %c0_4 = arith.constant 0 : index
    %c0_5 = arith.constant 0 : index
    %4 = vector.load %arg1[%c2, %c0_4, %c0_5] : memref<3x49x512xf32, #tpu.memory_space<vmem>>, vector<1x49x512xf32>
    %5 = vector.shape_cast %4 : vector<1x49x512xf32> to vector<49x512xf32>
    %6 = arith.maximumf %1, %3 : vector<49x512xf32>
    %7 = arith.maximumf %6, %5 : vector<49x512xf32>
    %8 = arith.minimumf %1, %3 : vector<49x512xf32>
    %9 = arith.minimumf %8, %5 : vector<49x512xf32>
    %10 = arith.subf %7, %9 : vector<49x512xf32>
    %cst = arith.constant 9.99999993E-9 : f32
    %11 = vector.broadcast %cst : f32 to vector<49x512xf32>
    %12 = arith.addf %7, %11 : vector<49x512xf32>
    %13 = tpu.reciprocal %12 : vector<49x512xf32> -> vector<49x512xf32>
    %14 = arith.mulf %10, %13 : vector<49x512xf32>
    %c0_6 = arith.constant 0 : index
    %c0_7 = arith.constant 0 : index
    %15 = vector.load %arg3[%c0_6, %c0_7] : memref<8x49xf32, #tpu.memory_space<vmem>>, vector<8x49xf32>
    %cst_8 = arith.constant dense<0.000000e+00> : vector<8x512xf32>
    %16 = tpu.matmul %15, %14, %cst_8 {dimension_numbers = #tpu.dot_dimension_numbers<[1], [0], [0], [1], [0, 0, 1, 1], [], []>} : vector<8x49xf32>, vector<49x512xf32>, vector<8x512xf32> -> vector<8x512xf32>
    %c0_9 = arith.constant 0 : index
    %c0_10 = arith.constant 0 : index
    %17 = vector.load %arg4[%c0_9, %c0_10] : memref<8x1xf32, #tpu.memory_space<vmem>>, vector<8x1xf32>
    %18 = vector.broadcast %17 : vector<8x1xf32> to vector<8x512xf32>
    %19 = arith.addf %16, %18 : vector<8x512xf32>
    %cst_11 = arith.constant 0.000000e+00 : f32
    %20 = vector.broadcast %cst_11 : f32 to vector<8x512xf32>
    %21 = arith.maximumf %19, %20 : vector<8x512xf32>
    %c0_12 = arith.constant 0 : index
    %c0_13 = arith.constant 0 : index
    %22 = vector.load %arg5[%c0_12, %c0_13] : memref<16x27xf32, #tpu.memory_space<vmem>>, vector<16x27xf32>
    %c0_14 = arith.constant 0 : index
    %c0_15 = arith.constant 0 : index
    %23 = vector.load %arg2[%c0_14, %c0_15] : memref<27x512xf32, #tpu.memory_space<vmem>>, vector<27x512xf32>
    %cst_16 = arith.constant dense<0.000000e+00> : vector<16x512xf32>
    %24 = tpu.matmul %22, %23, %cst_16 {dimension_numbers = #tpu.dot_dimension_numbers<[1], [0], [0], [1], [0, 0, 1, 1], [], []>} : vector<16x27xf32>, vector<27x512xf32>, vector<16x512xf32> -> vector<16x512xf32>
    %c0_17 = arith.constant 0 : index
    %c0_18 = arith.constant 0 : index
    %25 = vector.load %arg6[%c0_17, %c0_18] : memref<16x1xf32, #tpu.memory_space<vmem>>, vector<16x1xf32>
    %26 = vector.broadcast %25 : vector<16x1xf32> to vector<16x512xf32>
    %27 = arith.addf %24, %26 : vector<16x512xf32>
    %cst_19 = arith.constant 0.000000e+00 : f32
    %28 = vector.broadcast %cst_19 : f32 to vector<16x512xf32>
    %29 = arith.maximumf %27, %28 : vector<16x512xf32>
    %30 = tpu.concatenate %29, %21 in 0 : vector<16x512xf32>, vector<8x512xf32> -> vector<24x512xf32>
    %c0_20 = arith.constant 0 : index
    %c0_21 = arith.constant 0 : index
    %31 = vector.load %arg7[%c0_20, %c0_21] : memref<4x24xf32, #tpu.memory_space<vmem>>, vector<4x24xf32>
    %cst_22 = arith.constant dense<0.000000e+00> : vector<4x512xf32>
    %32 = tpu.matmul %31, %30, %cst_22 {dimension_numbers = #tpu.dot_dimension_numbers<[1], [0], [0], [1], [0, 0, 1, 1], [], []>} : vector<4x24xf32>, vector<24x512xf32>, vector<4x512xf32> -> vector<4x512xf32>
    %c0_23 = arith.constant 0 : index
    %c0_24 = arith.constant 0 : index
    %33 = vector.load %arg8[%c0_23, %c0_24] : memref<4x1xf32, #tpu.memory_space<vmem>>, vector<4x1xf32>
    %34 = vector.broadcast %33 : vector<4x1xf32> to vector<4x512xf32>
    %35 = arith.addf %32, %34 : vector<4x512xf32>
    %36 = vector.extract_strided_slice %35 {offsets = [0, 0], sizes = [4, 256], strides = [1, 1]} : vector<4x512xf32> to vector<4x256xf32>
    %c0_25 = arith.constant 0 : index
    %c0_26 = arith.constant 0 : index
    %c0_27 = arith.constant 0 : index
    %37 = vector.load %arg9[%c0_25, %c0_26, %c0_27] : memref<2x4x256xf32, #tpu.memory_space<vmem>>, vector<1x4x256xf32>
    %38 = vector.shape_cast %37 : vector<1x4x256xf32> to vector<4x256xf32>
    %39 = vector.shape_cast %36 : vector<4x256xf32> to vector<1x4x256xf32>
    tpu.vector_store %arg9[%c0_25, %c0_26, %c0_27], %39 {strides = array<i32>} : memref<2x4x256xf32, #tpu.memory_space<vmem>>, vector<1x4x256xf32>,
    %40 = vector.extract_strided_slice %35 {offsets = [0, 256], sizes = [4, 256], strides = [1, 1]} : vector<4x512xf32> to vector<4x256xf32>
    %c1_28 = arith.constant 1 : index
    %c0_29 = arith.constant 0 : index
    %c0_30 = arith.constant 0 : index
    %41 = vector.load %arg9[%c1_28, %c0_29, %c0_30] : memref<2x4x256xf32, #tpu.memory_space<vmem>>, vector<1x4x256xf32>
    %42 = vector.shape_cast %41 : vector<1x4x256xf32> to vector<4x256xf32>
    %43 = vector.shape_cast %40 : vector<4x256xf32> to vector<1x4x256xf32>
    tpu.vector_store %arg9[%c1_28, %c0_29, %c0_30], %43 {strides = array<i32>} : memref<2x4x256xf32, #tpu.memory_space<vmem>>, vector<1x4x256xf32>,
    return
  }
  func.func @transform_0(%arg0: i32) -> (i32, i32, i32) {
    %c0_i32 = arith.constant 0 : i32
    %c0_i32_0 = arith.constant 0 : i32
    %c0_i32_1 = arith.constant 0 : i32
    return %c0_i32, %c0_i32_0, %arg0 : i32, i32, i32
  }
  func.func @transform_1(%arg0: i32) -> (i32, i32) {
    %c0_i32 = arith.constant 0 : i32
    %c0_i32_0 = arith.constant 0 : i32
    return %c0_i32, %arg0 : i32, i32
  }
  func.func @transform_2(%arg0: i32) -> (i32, i32) {
    %c0_i32 = arith.constant 0 : i32
    %c0_i32_0 = arith.constant 0 : i32
    %c0_i32_1 = arith.constant 0 : i32
    return %c0_i32, %c0_i32_0 : i32, i32
  }
  func.func @transform_3(%arg0: i32) -> (i32, i32) {
    %c0_i32 = arith.constant 0 : i32
    %c0_i32_0 = arith.constant 0 : i32
    %c0_i32_1 = arith.constant 0 : i32
    return %c0_i32, %c0_i32_0 : i32, i32
  }
  func.func @transform_4(%arg0: i32) -> (i32, i32) {
    %c0_i32 = arith.constant 0 : i32
    %c0_i32_0 = arith.constant 0 : i32
    %c0_i32_1 = arith.constant 0 : i32
    return %c0_i32, %c0_i32_0 : i32, i32
  }
  func.func @transform_5(%arg0: i32) -> (i32, i32) {
    %c0_i32 = arith.constant 0 : i32
    %c0_i32_0 = arith.constant 0 : i32
    %c0_i32_1 = arith.constant 0 : i32
    return %c0_i32, %c0_i32_0 : i32, i32
  }
  func.func @transform_6(%arg0: i32) -> (i32, i32) {
    %c0_i32 = arith.constant 0 : i32
    %c0_i32_0 = arith.constant 0 : i32
    %c0_i32_1 = arith.constant 0 : i32
    return %c0_i32, %c0_i32_0 : i32, i32
  }
  func.func @transform_7(%arg0: i32) -> (i32, i32) {
    %c0_i32 = arith.constant 0 : i32
    %c0_i32_0 = arith.constant 0 : i32
    %c0_i32_1 = arith.constant 0 : i32
    return %c0_i32, %c0_i32_0 : i32, i32
  }
  func.func @transform_8(%arg0: i32) -> (i32, i32, i32) {
    %c0_i32 = arith.constant 0 : i32
    %c0_i32_0 = arith.constant 0 : i32
    %c0_i32_1 = arith.constant 0 : i32
    return %arg0, %c0_i32, %c0_i32_0 : i32, i32, i32
  }
}

</mosaic_0001>

<bundles_post_ra>
// kernel: cnet_forward.1
= control target key start
LH: loop header
LB: loop body
LE: loop exit
PB: predicated region body
PF: predicated region fallthrough
CT: control target
= control target key end

     0   :  { %v1075_v3 = vmov 0.0   ;;  %v1076_v8 = vmov 0   ;;  %vm350_vm0 = vcmask 1040384   ;;  %vm546_vm1 = vcmask 1042432   ;;  %s1739_s0 = inlined_call_operand.vmem [shape: f32[3,49,512], index: 0, kind: input, shape index: {}]   ;;  %s1740_s3 = inlined_call_operand.vmem [shape: f32[8,1], index: 3, kind: input, shape index: {}]   ;;  %s1741_s5 = inlined_call_operand.vmem [shape: f32[16,1], index: 5, kind: input, shape index: {}]   ;;  %s1742_s7 = inlined_call_operand.vmem [shape: f32[4,1], index: 7, kind: input, shape index: {}]   ;;  %s1743_s1 = inlined_call_operand.vmem [shape: f32[27,512], index: 1, kind: input, shape index: {}]   ;;  %s1744_s2 = inlined_call_operand.vmem [shape: f32[8,49], index: 2, kind: input, shape index: {}]   ;;  %s1745_s4 = inlined_call_operand.vmem [shape: f32[16,27], index: 4, kind: input, shape index: {}]   ;;  %s1746_s6 = inlined_call_operand.vmem [shape: f32[4,24], index: 6, kind: input, shape index: {}]   ;;  %s1747_s8 = inlined_call_operand.vmem [shape: f32[2,4,256], index: 8, kind: output, shape index: {}]  }
   0x1   :  { %v30_v0 = vld [vmem:[%s1739_s0 + $0x8] sm:$0xff]  ;;  %427 = vmatprep.mubr.f32.mxu0 %v1075_v3  ;;  %498 = vmatprep.mubr.f32.mxu1 %v1075_v3  ;;  %v32_v12 = vld [vmem:[%s1739_s0 + $0x18] sm:$0xff]  ;;  %v29_v23 = vld [vmem:[%s1739_s0] sm:$0xff]  ;;  %vm346_vm2 = vcmask 400384   ;;  %vm1077_vm3 = vmmov 1   ;;  %vm539_vm5 = vcmask 220160  }
   0x2   :  { %v34_v1 = vld [vmem:[%s1739_s0 + $0x28] sm:$0xff]  ;;  %1018 = vset.pattern.permute.xlu1 %v1076_v8  ;;  %1017 = vset.pattern.permute.xlu0 %v1076_v8  ;;  %v36_v13 = vld [vmem:[%s1739_s0 + $0x38] sm:$0xff]  ;;  %v889_v24 = vld [vmem:[%s1739_s0 + $0xe0] sm:$0xff]  ;;  %vm728_vm6 = vcmask 195584  }
   0x3   :  { %v890_v2 = vld [vmem:[%s1739_s0 + $0xe8] sm:$0xff]  ;;  %v892_v14 = vld [vmem:[%s1739_s0 + $0xf8] sm:$0xff]  ;;  %v33_v27 = vld [vmem:[%s1739_s0 + $0x20] sm:$0xff]  ;;  %v115_v38 = vmax.f32 %v29_v23, %v889_v24  ;;  %v171_v46 = vmin.f32 %v29_v23, %v889_v24 }
   0x4   :  { %v894_v4 = vld [vmem:[%s1739_s0 + $0x108] sm:$0xff]  ;;  %v116_v7 = vmax.f32 %v30_v0, %v890_v2  ;;  %v172_v10 = vmin.f32 %v30_v0, %v890_v2  ;;  %v896_v16 = vld [vmem:[%s1739_s0 + $0x118] sm:$0xff]  ;;  %v118_v19 = vmax.f32 %v32_v12, %v892_v14  ;;  %v174_v22 = vmin.f32 %v32_v12, %v892_v14  ;;  %v893_v28 = vld [vmem:[%s1739_s0 + $0x100] sm:$0xff] }
   0x5   :  { %v918_v5 = vld [vmem:[%s1739_s0 + $0x1c8] sm:$0xff]  ;;  %v120_v9 = vmax.f32 %v34_v1, %v894_v4  ;;  %v176_v11 = vmin.f32 %v34_v1, %v894_v4  ;;  %v920_v17 = vld [vmem:[%s1739_s0 + $0x1d8] sm:$0xff]  ;;  %v122_v21 = vmax.f32 %v36_v13, %v896_v16  ;;  %v917_v33 = vld [vmem:[%s1739_s0 + $0x1c0] sm:$0xff]  ;;  %v178_v36 = vmin.f32 %v36_v13, %v896_v16 }
   0x6   :  { %v922_v6 = vld [vmem:[%s1739_s0 + $0x1e8] sm:$0xff]  ;;  %v1152_v15 = vmax.f32 %v116_v7, %v918_v5  ;;  %v924_v18 = vld [vmem:[%s1739_s0 + $0x1f8] sm:$0xff]  ;;  %v1172_v26 = vmax.f32 %v118_v19, %v920_v17  ;;  %v1180_v29 = vmin.f32 %v172_v10, %v918_v5  ;;  %v921_v34 = vld [vmem:[%s1739_s0 + $0x1e0] sm:$0xff]  ;;  %v1210_v42 = vmin.f32 %v174_v22, %v920_v17 }
   0x7   :  { %v1163_v20 = vmax.f32 %v120_v9, %v922_v6  ;;  %v1182_v30 = vmin.f32 %v176_v11, %v922_v6  ;;  %v1185_v32 = vmax.f32 %v122_v21, %v924_v18  ;;  %v31_v35 = vld [vmem:[%s1739_s0 + $0x10] sm:$0xff]  ;;  %v119_v44 = vmax.f32 %v33_v27, %v893_v28  ;;  %v38_v56 = vld [vmem:[%s1739_s0 + $0x48] sm:$0xff]  ;;  %v1258_v4 = vld [vmem:[%s1739_s0 + $0x58] sm:$0xff] }
   0x8   :  { %v256_v25 = vadd.f32 1e-08, %v1152_v15  ;;  %v258_v37 = vadd.f32 1e-08, %v1172_v26  ;;  %v1200_v39 = vld [vmem:[%s1739_s0 + $0x30] sm:$0xff]  ;;  %v1213_v45 = vmax.f32 %v115_v38, %v917_v33  ;;  %v175_v47 = vmin.f32 %v33_v27, %v893_v28  ;;  %v1239_v61 = vld [vmem:[%s1739_s0 + $0x68] sm:$0xff]  ;;  %vm1697_vm4 = vmpackc.low %vm546_vm1, %vm1077_vm3 }
   0x9   :  { %v260_v31 = vadd.f32 1e-08, %v1163_v20  ;;  %v891_v40 = vld [vmem:[%s1739_s0 + $0xf0] sm:$0xff]  ;;  %v262_v43 = vadd.f32 1e-08, %v1185_v32  ;;  %v1221_v50 = vmax.f32 %v119_v44, %v921_v34  ;;  %v206_v53 = vmin.f32 %v178_v36, %v924_v18  ;;  %v898_v62 = vld [vmem:[%s1739_s0 + $0x128] sm:$0xff] }
   0xa   :  { %1019 = vrcp.f32 %v256_v25  ;;  %v1208_v41 = vld [vmem:[%s1739_s0 + $0x110] sm:$0xff]  ;;  %v117_v51 = vmax.f32 %v31_v35, %v891_v40  ;;  %v1225_v54 = vmin.f32 %v171_v46, %v917_v33  ;;  %v255_v55 = vadd.f32 1e-08, %v1213_v45  ;;  %v1247_v63 = vld [vmem:[%s1739_s0 + $0x148] sm:$0xff]  ;;  %v1263_v5 = vld [vmem:[%s1739_s0 + $0x138] sm:$0xff] }
   0xb   :  { %1021 = vrcp.f32 %v260_v31  ;;  %v919_v48 = vld [vmem:[%s1739_s0 + $0x1d0] sm:$0xff]  ;;  %v121_v52 = vmax.f32 %v1200_v39, %v1208_v41  ;;  %v259_v57 = vadd.f32 1e-08, %v1221_v50  ;;  %v173_v60 = vmin.f32 %v31_v35, %v891_v40  ;;  %v926_v9 = vld [vmem:[%s1739_s0 + $0x208] sm:$0xff]  ;;  %v1288_v16 = vld [vmem:[%s1739_s0 + $0x158] sm:$0xff] }
   0xc   :  { %1023 = vrcp.f32 %v258_v37  ;;  %v923_v49 = vld [vmem:[%s1739_s0 + $0x1f0] sm:$0xff]  ;;  %v1232_v58 = vmax.f32 %v117_v51, %v919_v48  ;;  %v228_v0 = vsub.f32 %v1152_v15, %v1180_v29  ;;  %v232_v1 = vsub.f32 %v1163_v20, %v1182_v30  ;;  %v930_v10 = vld [vmem:[%s1739_s0 + $0x228] sm:$0xff]  ;;  %v1283_v15 = vld [vmem:[%s1739_s0 + $0x78] sm:$0xff] }
   0xd   :  { %1025 = vrcp.f32 %v262_v43  ;;  %v1234_v59 = vmax.f32 %v121_v52, %v923_v49  ;;  %v230_v2 = vsub.f32 %v1172_v26, %v1210_v42  ;;  %v1265_v6 = vmin.f32 %v175_v47, %v921_v34  ;;  %v928_v17 = vld [vmem:[%s1739_s0 + $0x218] sm:$0xff]  ;;  %v1319_v36 = vld [vmem:[%s1739_s0 + $0x40] sm:$0xff] }
   0xe   :  { %1027 = vrcp.f32 %v255_v55  ;;  %v257_v7 = vadd.f32 1e-08, %v1232_v58  ;;  %v234_v11 = vsub.f32 %v1185_v32, %v206_v53  ;;  %v177_v12 = vmin.f32 %v1200_v39, %v1208_v41  ;;  %v1306_v25 = vld [vmem:[%s1739_s0 + $0x238] sm:$0xff]  ;;  %v1331_v42 = vld [vmem:[%s1739_s0 + $0x60] sm:$0xff] }
   0xf   :  { %1029 = vrcp.f32 %v259_v57  ;;  %v261_v8 = vadd.f32 1e-08, %v1234_v59  ;;  %v124_v13 = vmax.f32 %v38_v56, %v898_v62  ;;  %v128_v14 = vmax.f32 %v1239_v61, %v1247_v63  ;;  %v897_v43 = vld [vmem:[%s1739_s0 + $0x120] sm:$0xff] }
  0x10   :  { %v227_v18 = vsub.f32 %v1213_v45, %v1225_v54  ;;  %v1295_v19 = vmin.f32 %v173_v60, %v919_v48  ;;  %1031 = vrcp.f32 %v257_v7  ;;  %v126_v20 = vmax.f32 %v1258_v4, %v1263_v5  ;;  %v1339_v44 = vld [vmem:[%s1739_s0 + $0x140] sm:$0xff]  ;;  %v1365_v60 = vld [vmem:[%s1739_s0 + $0x130] sm:$0xff] }
  0x11   :  { %1033 = vrcp.f32 %v261_v8  ;;  %v1299_v22 = vmax.f32 %v124_v13, %v926_v9  ;;  %v1301_v23 = vmax.f32 %v128_v14, %v930_v10  ;;  %v180_v24 = vmin.f32 %v38_v56, %v898_v62  ;;  %v925_v51 = vld [vmem:[%s1739_s0 + $0x200] sm:$0xff] }
  0x12   :  { %v231_v28 = vsub.f32 %v1221_v50, %v1265_v6  ;;  %v130_v29 = vmax.f32 %v1283_v15, %v1288_v16  ;;  %v1312_v30 = vmax.f32 %v126_v20, %v928_v17  ;;  %v205_v33 = vmin.f32 %v177_v12, %v923_v49  ;;  %v929_v55 = vld [vmem:[%s1739_s0 + $0x220] sm:$0xff] }
  0x13   :  { %v264_v34 = vadd.f32 1e-08, %v1299_v22  ;;  %v268_v35 = vadd.f32 1e-08, %v1301_v23  ;;  %v229_v39 = vsub.f32 %v1232_v58, %v1295_v19  ;;  %v184_v40 = vmin.f32 %v1239_v61, %v1247_v63  ;;  %v1360_v58 = vld [vmem:[%s1739_s0 + $0x50] sm:$0xff] }
  0x14   :  { %v1020_v21 = vpop.eup %1019  ;;  %v1326_v41 = vmax.f32 %v130_v29, %v1306_v25  ;;  %v1341_v47 = vmin.f32 %v180_v24, %v926_v9  ;;  %v182_v48 = vmin.f32 %v1258_v4, %v1263_v5  ;;  %v266_v49 = vadd.f32 1e-08, %v1312_v30  ;;  %v1408_v24 = vld [vmem:[%s1739_s0 + $0x168] sm:$0xff] }
  0x15   :  { %v1022_v26 = vpop.eup %1021  ;;  %v312_v27 = vmul.f32 %v1020_v21, %v228_v0  ;;  %1035 = vrcp.f32 %v264_v34  ;;  %v233_v54 = vsub.f32 %v1234_v59, %v205_v33  ;;  %v123_v56 = vmax.f32 %v1319_v36, %v897_v43  ;;  %v1372_v0 = vld [vmem:[%s1739_s0 + $0x70] sm:$0xff]  ;;  %v934_v33 = vld [vmem:[%s1739_s0 + $0x248] sm:$0xff] }
  0x16   :  { %v1024_v31 = vpop.eup %1023  ;;  %v316_v32 = vmul.f32 %v1022_v26, %v232_v1  ;;  %1037 = vrcp.f32 %v268_v35  ;;  %v270_v50 = vadd.f32 1e-08, %v1326_v41  ;;  %v127_v57 = vmax.f32 %v1331_v42, %v1339_v44  ;;  %v1377_v1 = vld [vmem:[%s1739_s0 + $0x150] sm:$0xff] }
  0x17   :  { %v1026_v37 = vpop.eup %1025  ;;  %v314_v38 = vmul.f32 %v1024_v31, %v230_v2  ;;  %v212_v62 = vmin.f32 %v184_v40, %v930_v10  ;;  %v186_v63 = vmin.f32 %v1283_v15, %v1288_v16  ;;  %1039 = vrcp.f32 %v266_v49  ;;  %v927_v10 = vld [vmem:[%s1739_s0 + $0x210] sm:$0xff] }
  0x18   :  { %v962_v45 = vpack.c.bf16 %v316_v32, %v312_v27  ;;  %v318_v46 = vmul.f32 %v1026_v37, %v234_v11  ;;  %v1028_v52 = vpop.eup %1027  ;;  %v236_v4 = vsub.f32 %v1299_v22, %v1341_v47  ;;  %1041 = vrcp.f32 %v270_v50  ;;  %v931_v11 = vld [vmem:[%s1739_s0 + $0x230] sm:$0xff]  ;;  %v1403_v22 = vld [vmem:[%s1739_s0 + $0x88] sm:$0xff] }
  0x19   :  { %v1030_v59 = vpop.eup %1029  ;;  %v311_v61 = vmul.f32 %v1028_v52, %v227_v18  ;;  %v1381_v5 = vmax.f32 %v123_v56, %v925_v51  ;;  %v210_v7 = vmin.f32 %v182_v48, %v928_v17  ;;  %v1383_v8 = vmax.f32 %v127_v57, %v929_v55  ;;  %v1419_v27 = vld [vmem:[%s1739_s0 + $0xa8] sm:$0xff]  ;;  %v1453_v48 = vld [vmem:[%s1739_s0 + $0x98] sm:$0xff] }
  0x1a   :  { %963 = vmatprep.subr.bf16.mxu0 %v962_v45  ;;  %v974_v53 = vpack.c.bf16 %v318_v46, %v314_v38  ;;  %v315_v2 = vmul.f32 %v1030_v59, %v231_v28  ;;  %v1032_v6 = vpop.eup %1031  ;;  %v179_v9 = vmin.f32 %v1319_v36, %v897_v43  ;;  %v125_v12 = vmax.f32 %v1360_v58, %v1365_v60  ;;  %v1424_v28 = vld [vmem:[%s1739_s0 + $0x188] sm:$0xff]  ;;  %v936_v59 = vld [vmem:[%s1739_s0 + $0x258] sm:$0xff] }
  0x1b   :  { %v1034_v13 = vpop.eup %1033  ;;  %v313_v15 = vmul.f32 %v1032_v6, %v229_v39  ;;  %v263_v16 = vadd.f32 1e-08, %v1381_v5  ;;  %v129_v17 = vmax.f32 %v1372_v0, %v1377_v1  ;;  %v240_v19 = vsub.f32 %v1301_v23, %v212_v62  ;;  %v1439_v38 = vld [vmem:[%s1739_s0 + $0x268] sm:$0xff]  ;;  %v1491_v62 = vld [vmem:[%s1739_s0 + $0x80] sm:$0xff] }
  0x1c   :  { %975 = vmatprep.subr.bf16.mxu1 %v974_v53  ;;  %v964_v14 = vpack.c.bf16 %v315_v2, %v311_v61  ;;  %v317_v18 = vmul.f32 %v1034_v13, %v233_v54  ;;  %v214_v20 = vmin.f32 %v186_v63, %v1306_v25  ;;  %v267_v21 = vadd.f32 1e-08, %v1383_v8  ;;  %v1470_v53 = vld [vmem:[%s1739_s0 + $0xb8] sm:$0xff]  ;;  %v527_v6 = vld [vmem:[%s1741_s5] sm:$0xff] }
  0x1d   :  { %v183_v26 = vmin.f32 %v1331_v42, %v1339_v44  ;;  %1043 = vrcp.f32 %v263_v16  ;;  %v1412_v23 = vmax.f32 %v125_v12, %v927_v10  ;;  %v1414_v25 = vmax.f32 %v129_v17, %v931_v11  ;;  %v1475_v54 = vld [vmem:[%s1739_s0 + $0x198] sm:$0xff]  ;;  %v1520_v12 = vld [vmem:[%s1739_s0 + $0x180] sm:$0xff]  ;;  %531 = vperm.xlu0 %1017, %v527_v6  }
  0x1e   :  { %965 = vmatpush1.bf16.msra.mxu0 %v964_v14  ;;  %v976_v29 = vpack.c.bf16 %v317_v18, %v313_v15  ;;  %v1426_v31 = vmin.f32 %v179_v9, %v925_v51  ;;  %1045 = vrcp.f32 %v267_v21  ;;  %v181_v32 = vmin.f32 %v1360_v58, %v1365_v60  ;;  %v1486_v61 = vld [vmem:[%s1739_s0 + $0x278] sm:$0xff]  ;;  %v722_v15 = vld [vmem:[%s1742_s7] sm:$0xf] }
  0x1f   :  { %v1036_v34 = vpop.eup %1035  ;;  %v238_v35 = vsub.f32 %v1312_v30, %v210_v7  ;;  %v265_v36 = vadd.f32 1e-08, %v1412_v23  ;;  %v269_v37 = vadd.f32 1e-08, %v1414_v25  ;;  %v132_v39 = vmax.f32 %v1403_v22, %v1408_v24  ;;  %v937_v21 = vld [vmem:[%s1739_s0 + $0x260] sm:$0xff] }
  0x20   :  { %v1038_v40 = vpop.eup %1037  ;;  %977 = vmatpush1.bf16.msra.mxu1 %v976_v29  ;;  %v320_v42 = vmul.f32 %v1036_v34, %v236_v4  ;;  %v242_v43 = vsub.f32 %v1326_v41, %v214_v20  ;;  %v185_v30 = vmin.f32 %v1372_v0, %v1377_v1  ;;  %v136_v44 = vmax.f32 %v1419_v27, %v1424_v28  ;;  %v1458_v41 = vld [vmem:[%s1739_s0 + $0x178] sm:$0xff]  ;;  %v1499_v4 = vld [vmem:[%s1739_s0 + $0x160] sm:$0xff] }
  0x21   :  { %v324_v45 = vmul.f32 %v1038_v40, %v240_v19  ;;  %v211_v46 = vmin.f32 %v183_v26, %v929_v55  ;;  %1047 = vrcp.f32 %v265_v36  ;;  %v1448_v47 = vmax.f32 %v132_v39, %v934_v33  ;;  %v1040_v49 = vpop.eup %1039  ;;  %v933_v20 = vld [vmem:[%s1739_s0 + $0x240] sm:$0xff]  ;;  %v1572_v39 = vld [vmem:[%s1739_s0 + $0x170] sm:$0xff] }
  0x22   :  { %v235_v50 = vsub.f32 %v1381_v5, %v1426_v31  ;;  %v1462_v51 = vmin.f32 %v181_v32, %v927_v10  ;;  %1049 = vrcp.f32 %v269_v37  ;;  %v1465_v52 = vmax.f32 %v136_v44, %v1439_v38  ;;  %v1042_v55 = vpop.eup %1041  ;;  %v340_v5 = vld [vmem:[%s1740_s3] sm:$0xff]  ;;  %v1577_v40 = vld [vmem:[%s1739_s0 + $0x190] sm:$0xff] }
  0x23   :  { %v966_v56 = vpack.c.bf16 %v324_v45, %v320_v42  ;;  %v322_v57 = vmul.f32 %v1040_v49, %v238_v35  ;;  %v188_v58 = vmin.f32 %v1403_v22, %v1408_v24  ;;  %v272_v60 = vadd.f32 1e-08, %v1448_v47  ;;  %343 = vperm.xlu1 %1018, %v340_v5   ;;  %v528_v24 = vld [vmem:[%s1741_s5 + $0x8] sm:$0xff]  ;;  %v1556_v35 = vld [vmem:[%s1739_s0 + $0x90] sm:$0xff] }
  0x24   :  { %v326_v63 = vmul.f32 %v1042_v55, %v242_v43  ;;  %v213_v0 = vmin.f32 %v185_v30, %v931_v11  ;;  %v276_v1 = vadd.f32 1e-08, %v1465_v52  ;;  %v134_v2 = vmax.f32 %v1453_v48, %v1458_v41  ;;  %v1515_v11 = vld [vmem:[%s1739_s0 + $0xa0] sm:$0xff]  ;;  %536 = vperm.xlu0 %1017, %v528_v24  }
  0x25   :  { %967 = vmatprep.subr.bf16.mxu0 %v966_v56  ;;  %v239_v7 = vsub.f32 %v1383_v8, %v211_v46  ;;  %v192_v9 = vmin.f32 %v1419_v27, %v1424_v28  ;;  %1051 = vrcp.f32 %v272_v60  ;;  %v138_v10 = vmax.f32 %v1470_v53, %v1475_v54  ;;  %v54_v56 = vld [vmem:[%s1739_s0 + $0xc8] sm:$0x1] }
  0x26   :  { %v978_v13 = vpack.c.bf16 %v326_v63, %v322_v57  ;;  %v237_v8 = vsub.f32 %v1412_v23, %v1462_v51  ;;  %1053 = vrcp.f32 %v276_v1  ;;  %v1524_v14 = vmax.f32 %v134_v2, %v936_v59  ;;  %v939_v51 = vld [vmem:[%s1739_s0 + $0x270] sm:$0xff]  ;;  %v914_v57 = vld [vmem:[%s1739_s0 + $0x1a8] sm:$0x1]  ;;  %v56_v1 = vld [vmem:[%s1739_s0 + $0xd8] sm:$0x1] }
  0x27   :  { %v1044_v16 = vpop.eup %1043  ;;  %v216_v17 = vmin.f32 %v188_v58, %v934_v33  ;;  %v1530_v18 = vmax.f32 %v138_v10, %v1486_v61  ;;  %v190_v19 = vmin.f32 %v1453_v48, %v1458_v41  ;;  %v131_v22 = vmax.f32 %v1491_v62, %v1499_v4  ;;  %725 = vperm.xlu1 %1018, %v722_v15   ;;  %v53_v10 = vld [vmem:[%s1739_s0 + $0xc0] sm:$0x1] }
  0x28   :  { %v1046_v26 = vpop.eup %1045  ;;  %979 = vmatprep.subr.bf16.mxu1 %v978_v13  ;;  %v319_v23 = vmul.f32 %v1044_v16, %v235_v50  ;;  %v241_v27 = vsub.f32 %v1414_v25, %v213_v0  ;;  %v274_v28 = vadd.f32 1e-08, %v1524_v14  ;;  %v135_v29 = vmax.f32 %v1515_v11, %v1520_v12  ;;  %v935_v50 = vld [vmem:[%s1739_s0 + $0x250] sm:$0xff]  ;;  %v942_v0 = vld [vmem:[%s1739_s0 + $0x288] sm:$0x1] }
  0x29   :  { %v323_v31 = vmul.f32 %v1046_v26, %v239_v7  ;;  %v220_v32 = vmin.f32 %v192_v9, %v1439_v38  ;;  %v194_v33 = vmin.f32 %v1470_v53, %v1475_v54  ;;  %v278_v34 = vadd.f32 1e-08, %v1530_v18  ;;  %v1567_v38 = vld [vmem:[%s1739_s0 + $0xb0] sm:$0xff]  ;;  %v944_v9 = vld [vmem:[%s1739_s0 + $0x298] sm:$0x1] }
  0x2a   :  { %1055 = vrcp.f32 %v274_v28  ;;  %v1558_v25 = vmax.f32 %v131_v22, %v933_v20  ;;  %v1560_v36 = vmax.f32 %v135_v29, %v937_v21  ;;  %v187_v37 = vmin.f32 %v1491_v62, %v1499_v4  ;;  %v941_v22 = vld [vmem:[%s1739_s0 + $0x280] sm:$0x1]  ;;  %v915_v28 = vld [vmem:[%s1739_s0 + $0x1b0] sm:$0x1] }
  0x2b   :  { %v1048_v42 = vpop.eup %1047  ;;  %v968_v43 = vpack.c.bf16 %v323_v31, %v319_v23  ;;  %v244_v30 = vsub.f32 %v1448_v47, %v216_v17  ;;  %v218_v44 = vmin.f32 %v190_v19, %v936_v59  ;;  %1057 = vrcp.f32 %v278_v34 }
  0x2c   :  { %v1050_v45 = vpop.eup %1049  ;;  %v321_v46 = vmul.f32 %v1048_v42, %v237_v8  ;;  %v191_v48 = vmin.f32 %v1515_v11, %v1520_v12  ;;  %v271_v41 = vadd.f32 1e-08, %v1558_v25  ;;  %v275_v49 = vadd.f32 1e-08, %v1560_v36 }
  0x2d   :  { %969 = vmatpush1.bf16.msra.mxu0 %v968_v43  ;;  %v325_v47 = vmul.f32 %v1050_v45, %v241_v27  ;;  %v248_v53 = vsub.f32 %v1465_v52, %v220_v32  ;;  %v133_v54 = vmax.f32 %v1556_v35, %v1572_v39  ;;  %v137_v55 = vmax.f32 %v1567_v38, %v1577_v40 }
  0x2e   :  { %v222_v58 = vmin.f32 %v194_v33, %v1486_v61  ;;  %v215_v60 = vmin.f32 %v187_v37, %v933_v20  ;;  %1059 = vrcp.f32 %v271_v41  ;;  %v916_v61 = vld [vmem:[%s1739_s0 + $0x1b8] sm:$0x1]  ;;  %v246_v5 = vsub.f32 %v1524_v14, %v218_v44  ;;  %v913_v14 = vld [vmem:[%s1739_s0 + $0x1a0] sm:$0x1] }
  0x2f   :  { %v1052_v59 = vpop.eup %1051  ;;  %v980_v52 = vpack.c.bf16 %v325_v47, %v321_v46  ;;  %1061 = vrcp.f32 %v275_v49  ;;  %v1602_v62 = vmax.f32 %v133_v54, %v935_v50  ;;  %v1604_v63 = vmax.f32 %v137_v55, %v939_v51 }
  0x30   :  { %v1054_v2 = vpop.eup %1053  ;;  %v328_v4 = vmul.f32 %v1052_v59, %v244_v30  ;;  %v219_v6 = vmin.f32 %v191_v48, %v937_v21  ;;  %v140_v7 = vmax.f32 %v54_v56, %v914_v57  ;;  %v189_v12 = vmin.f32 %v1556_v35, %v1572_v39 }
  0x31   :  { %981 = vmatpush1.bf16.msra.mxu1 %v980_v52  ;;  %v332_v11 = vmul.f32 %v1054_v2, %v248_v53  ;;  %v273_v13 = vadd.f32 1e-08, %v1602_v62  ;;  %v277_v8 = vadd.f32 1e-08, %v1604_v63  ;;  %v250_v15 = vsub.f32 %v1530_v18, %v222_v58  ;;  %v55_v18 = vld [vmem:[%s1739_s0 + $0xd0] sm:$0x1] }
  0x32   :  { %v168_v16 = vmax.f32 %v140_v7, %v942_v0  ;;  %v142_v17 = vmax.f32 %v56_v1, %v916_v61  ;;  %v243_v20 = vsub.f32 %v1558_v25, %v215_v60  ;;  %v193_v21 = vmin.f32 %v1567_v38, %v1577_v40  ;;  %v943_v38 = vld [vmem:[%s1739_s0 + $0x290] sm:$0x1]  ;;  %v511_v7 = vld [vmem:[%s1743_s1] sm:$0xff] }
  0x33   :  { %v970_v19 = vpack.c.bf16 %v332_v11, %v328_v4  ;;  %1063 = vrcp.f32 %v273_v13  ;;  %v139_v27 = vmax.f32 %v53_v10, %v913_v14  ;;  %v247_v32 = vsub.f32 %v1560_v36, %v219_v6  ;;  %v520_v11 = vld [vmem:[%s1743_s1 + $0x48] sm:$0xff] }
  0x34   :  { %v1056_v24 = vpop.eup %1055  ;;  %1065 = vrcp.f32 %v277_v8  ;;  %v280_v26 = vadd.f32 1e-08, %v168_v16  ;;  %v170_v23 = vmax.f32 %v142_v17, %v944_v9  ;;  %v217_v33 = vmin.f32 %v189_v12, %v935_v50  ;;  %v524_v12 = vld [vmem:[%s1743_s1 + $0x68] sm:$0x7]  ;;  %v518_v17 = vld [vmem:[%s1743_s1 + $0x38] sm:$0xff] }
  0x35   :  { %v1058_v29 = vpop.eup %1057  ;;  %971 = vmatprep.subr.bf16.mxu0 %v970_v19  ;;  %v330_v31 = vmul.f32 %v1056_v24, %v246_v5  ;;  %v196_v34 = vmin.f32 %v54_v56, %v914_v57  ;;  %v167_v37 = vmax.f32 %v139_v27, %v941_v22  ;;  %v221_v39 = vmin.f32 %v193_v21, %v939_v51  ;;  %v516_v5 = vld [vmem:[%s1743_s1 + $0x28] sm:$0xff]  ;;  %v513_v21 = vld [vmem:[%s1743_s1 + $0x10] sm:$0xff]  ;;  %v522_v24 = vld [vmem:[%s1743_s1 + $0x58] sm:$0xff] }
  0x36   :  { %v334_v35 = vmul.f32 %v1058_v29, %v250_v15  ;;  %1067 = vrcp.f32 %v280_v26  ;;  %v282_v25 = vadd.f32 1e-08, %v170_v23  ;;  %v198_v40 = vmin.f32 %v56_v1, %v916_v61  ;;  %v519_v27 = vld [vmem:[%s1743_s1 + $0x40] sm:$0xff] }
  0x37   :  { %v141_v42 = vmax.f32 %v55_v18, %v915_v28  ;;  %v279_v44 = vadd.f32 1e-08, %v167_v37  ;;  %v224_v36 = vmin.f32 %v196_v34, %v942_v0  ;;  %v195_v48 = vmin.f32 %v53_v10, %v913_v14  ;;  %v339_v14 = vld [vmem:[%s1744_s2] sm:$0xff] }
  0x38   :  { %v1060_v43 = vpop.eup %1059  ;;  %v982_v30 = vpack.c.bf16 %v334_v35, %v330_v31  ;;  %1069 = vrcp.f32 %v282_v25  ;;  %v245_v50 = vsub.f32 %v1602_v62, %v217_v33  ;;  %v249_v47 = vsub.f32 %v1604_v63, %v221_v39  ;;  %v512_v63 = vld [vmem:[%s1743_s1 + $0x8] sm:$0xff]  ;;  %v521_v25 = vld [vmem:[%s1743_s1 + $0x50] sm:$0xff]  ;;  %v509_v39 = vld [vmem:[%s1745_s4] sm:$0xff] }
  0x39   :  { %v1062_v45 = vpop.eup %1061  ;;  %v327_v46 = vmul.f32 %v1060_v43, %v243_v20  ;;  %v169_v41 = vmax.f32 %v141_v42, %v943_v38  ;;  %1071 = vrcp.f32 %v279_v44  ;;  %v226_v53 = vmin.f32 %v198_v40, %v944_v9  ;;  %v515_v9 = vld [vmem:[%s1743_s1 + $0x20] sm:$0xff]  ;;  %v510_v40 = vld [vmem:[%s1745_s4 + $0x8] sm:$0xff] }
  0x3a   :  { %983 = vmatprep.subr.bf16.mxu1 %v982_v30  ;;  %v331_v49 = vmul.f32 %v1062_v45, %v247_v32  ;;  %v197_v55 = vmin.f32 %v55_v18, %v915_v28  ;;  %v252_v57 = vsub.f32 %v168_v16, %v224_v36  ;;  %v223_v58 = vmin.f32 %v195_v48, %v941_v22  ;;  %v514_v16 = vld [vmem:[%s1743_s1 + $0x18] sm:$0xff]  ;;  %v517_v22 = vld [vmem:[%s1743_s1 + $0x30] sm:$0xff]  ;;  %v523_v18 = vld [vmem:[%s1743_s1 + $0x60] sm:$0x7] }
  0x3b   :  { %v281_v51 = vadd.f32 1e-08, %v169_v41  ;;  %v254_v0 = vsub.f32 %v170_v23, %v226_v53  ;;  %v986_v15 = vpack.c.bf16 %v516_v5, %v512_v63  ;;  %v988_v20 = vpack.c.bf16 %v515_v9, %v511_v7  ;;  %v526_v23 = vld [vmem:[%s1743_s1 + $0x78] sm:$0x7] }
  0x3c   :  { %v972_v54 = vpack.c.bf16 %v331_v49, %v327_v46  ;;  %v225_v61 = vmin.f32 %v197_v55, %v943_v38  ;;  %v251_v4 = vsub.f32 %v167_v37, %v223_v58  ;;  %v990_v26 = vpack.c.bf16 %v524_v12, %v520_v11  ;;  %v525_v37 = vld [vmem:[%s1743_s1 + $0x70] sm:$0x7] }
  0x3d   :  { %v1064_v56 = vpop.eup %1063  ;;  %1073 = vrcp.f32 %v281_v51  ;;  %v996_v29 = vpack.c.bf16 %v518_v17, %v514_v16  ;;  %v998_v33 = vpack.c.bf16 %v517_v22, %v513_v21  ;;  %v1000_v34 = vpack.c.bf16 %v526_v23, %v522_v24  ;;  %v721_v17 = vld [vmem:[%s1746_s6] sm:$0xf] }
  0x3e   :  { %v1066_v60 = vpop.eup %1065  ;;  %973 = vmatpush1.bf16.msra.mxu0 %v972_v54  ;;  %v329_v59 = vmul.f32 %v1064_v56, %v245_v50  ;;  %v253_v8 = vsub.f32 %v169_v41, %v225_v61  ;;  %v993_v35 = vpack.c.bf16 %v523_v18, %v519_v27  ;;  %v1003_v38 = vpack.c.bf16 %v525_v37, %v521_v25 }
  0x3f   :  { %v333_v52 = vmul.f32 %v1066_v60, %v249_v47 }
  0x40   :  { %v1068_v1 = vpop.eup %1067 }
  0x41   :  { %v984_v62 = vpack.c.bf16 %v333_v52, %v329_v59  ;;  %v336_v2 = vmul.f32 %v1068_v1, %v252_v57 }
  0x42   :  { %v1070_v6 = vpop.eup %1069 }
  0x43   :  { %985 = vmatpush1.bf16.msra.mxu1 %v984_v62  ;;  %945 = vmatprep.subr.msk.mxu0 %vm350_vm0, %v336_v2  ;;  %v338_v10 = vmul.f32 %v1070_v6, %v254_v0  ;;  %v1072_v13 = vpop.eup %1071 }
  0x44   :  { %v335_v19 = vmul.f32 %v1072_v13, %v251_v4 }
  0x45   :  { %948 = vmatprep.subr.msk.mxu1 %vm350_vm0, %v338_v10 }
  0x46   :  { %946 = vmatpush1.msk.msra.mxu0 %vm350_vm0, %v335_v19 }
  0x47   :  { %v1074_v28 = vpop.eup %1073  ;;  %947 = vmatmul.mubr.msk.f32.vlgmr.msra.gmra.mrb[0].mxu0 %vm346_vm2, %v339_v14  ;;  %987 = vmatprep.subr.bf16.mxu0 %v986_v15 }
  0x48   :  { %v337_v32 = vmul.f32 %v1074_v28, %v253_v8  ;;  %989 = vmatpush1.bf16.msra.mxu0 %v988_v20  ;;  %623 = vmatprep.mubr.f32.mxu0 %v1075_v3 }
  0x49   :  { %992 = vmatprep.subr.msk.bf16.mxu0 %vm1697_vm4, %v990_v26 }
  0x4a   :  { %949 = vmatpush1.msk.msra.mxu1 %vm350_vm0, %v337_v32 }
  0x4b   :  { %950 = vmatmul.mubr.msk.f32.vlgmr.msra.gmra.mrb[0].mxu1 %vm346_vm2, %v339_v14  ;;  %997 = vmatprep.subr.bf16.mxu1 %v996_v29 }
  0x4c   :  { %999 = vmatpush1.bf16.msra.mxu1 %v998_v33  ;;  %700 = vmatprep.mubr.f32.mxu1 %v1075_v3 }
  0x4d   :  { %1002 = vmatprep.subr.msk.bf16.mxu1 %vm1697_vm4, %v1000_v34  ;;  %995 = vmatpush1.bf16.msk.msra.mxu0 %vm1697_vm4, %v993_v35 }
  0x50   :  { %1005 = vmatpush1.bf16.msk.msra.mxu1 %vm1697_vm4, %v1003_v38  ;;  %953 = vmatmul.mubr.msk.f32.vlgmr.msra.gmra.mrb[2].mxu0 %vm539_vm5, %v509_v39 }
  0x51   :  { %629 = vmatprep.mubr.f32.mxu0 %v1075_v3 }
  0x53   :  { %957 = vmatmul.mubr.msk.f32.vlgmr.msra.gmra.mrb[2].mxu1 %vm539_vm5, %v509_v39 }
  0x54   :  { %706 = vmatprep.mubr.f32.mxu1 %v1075_v3  ;;  %954 = vmatmul.mubr.msk.f32.gmra.mrb[4].mxu0 %vm539_vm5, %v510_v40 }
  0x55   :  { %796 = vmatprep.mubr.f32.mxu0 %v1075_v3 }
  0x57   :  { %958 = vmatmul.mubr.msk.f32.gmra.mrb[4].mxu1 %vm539_vm5, %v510_v40 }
  0x58   :  { %867 = vmatprep.mubr.f32.mxu1 %v1075_v3 }
  0x9c   :  { %v532_v45 = vpop.permute.xlu0 %531 }
  0xa2   :  { %v344_v51 = vpop.permute.xlu1 %343 }
  0xa3   :  { %v537_v49 = vpop.permute.xlu0 %536 }
  0xa6   :  { %v726_v20 = vpop.permute.xlu1 %725 }
 0x11a   :  { %v429_v42 = vpop.f32.mrb[0].mxu0 }
 0x11b   :  { %v431_v43 = vpop.f32.mrb[1].mxu0  ;;  %v430_v7 = vadd.f32 %v429_v42, %v344_v51 }
 0x11c   :  { %v432_v52 = vadd.f32 %v431_v43, %v344_v51 }
 0x11d   :  { %v505_v15 = vmax.f32 %v430_v7, 0.0 }
 0x11e   :  { %v500_v30 = vpop.f32.mrb[0].mxu1  ;;  %v506_v12 = vmax.f32 %v432_v52, 0.0 }
 0x11f   :  { %v502_v44 = vpop.f32.mrb[1].mxu1  ;;  %v501_v14 = vadd.f32 %v500_v30, %v344_v51 }
 0x120   :  { %v503_v9 = vadd.f32 %v502_v44, %v344_v51 }
 0x121   :  { %v507_v19 = vmax.f32 %v501_v14, 0.0 }
 0x122   :  { %v508_v16 = vmax.f32 %v503_v9, 0.0 }
 0x123   :  { %v625_v46 = vpop.f32.mrb[2].mxu0 }
 0x124   :  { %v627_v36 = vpop.f32.mrb[3].mxu0  ;;  %v626_v48 = vadd.f32 %v625_v46, %v532_v45 }
 0x125   :  { %v628_v50 = vadd.f32 %v627_v36, %v532_v45 }
 0x126   :  { %v702_v41 = vpop.f32.mrb[2].mxu1  ;;  %v713_v58 = vmax.f32 %v626_v48, 0.0 }
 0x127   :  { %v704_v47 = vpop.f32.mrb[3].mxu1  ;;  %v631_v53 = vpop.f32.mrb[4].mxu0  ;;  %v703_v56 = vadd.f32 %v702_v41, %v532_v45  ;;  %v714_v0 = vmax.f32 %v628_v50, 0.0 }
 0x128   :  { %v632_v54 = vadd.f32 %v631_v53, %v537_v49  ;;  %v633_v55 = vpop.f32.mrb[5].mxu0  ;;  %v705_v3 = vadd.f32 %v704_v47, %v532_v45 }
 0x129   :  { %v634_v57 = vadd.f32 %v633_v55, %v537_v49  ;;  %v715_v63 = vmax.f32 %v703_v56, 0.0 }
 0x12a   :  { %v717_v60 = vmax.f32 %v632_v54, 0.0  ;;  %v708_v59 = vpop.f32.mrb[4].mxu1  ;;  %v716_v10 = vmax.f32 %v705_v3, 0.0 }
 0x12b   :  { %v709_v1 = vadd.f32 %v708_v59, %v537_v49  ;;  %v718_v61 = vmax.f32 %v634_v57, 0.0  ;;  %v710_v62 = vpop.f32.mrb[5].mxu1 }
 0x12c   :  { %v1008_v2 = vpack.c.bf16 %v717_v60, %v713_v58  ;;  %v711_v4 = vadd.f32 %v710_v62, %v537_v49 }
 0x12d   :  { %v719_v5 = vmax.f32 %v709_v1, 0.0  ;;  %v1006_v6 = vpack.c.bf16 %v718_v61, %v714_v0 }
 0x12e   :  { %v720_v11 = vmax.f32 %v711_v4, 0.0 }
 0x12f   :  { %v1012_v13 = vpack.c.bf16 %v719_v5, %v715_v63  ;;  %1007 = vmatprep.subr.bf16.mxu0 %v1006_v6 }
 0x130   :  { %v1010_v8 = vpack.c.bf16 %v720_v11, %v716_v10  ;;  %1009 = vmatpush1.bf16.msra.mxu0 %v1008_v2 }
 0x131   :  { %736 = vmatprep.subr.mxu0 %v506_v12 }
 0x132   :  { %1011 = vmatprep.subr.bf16.mxu1 %v1010_v8 }
 0x133   :  { %1013 = vmatpush1.bf16.msra.mxu1 %v1012_v13 }
 0x134   :  { %807 = vmatprep.subr.mxu1 %v508_v16  ;;  %737 = vmatpush1.msra.mxu0 %v505_v15 }
 0x135   :  { %959 = vmatmul.mubr.msk.f32.vlgmr.msra.gmra.mrb[6].mxu0 %vm728_vm6, %v721_v17 }
 0x137   :  { %808 = vmatpush1.msra.mxu1 %v507_v19 }
 0x138   :  { %960 = vmatmul.mubr.msk.f32.vlgmr.msra.gmra.mrb[6].mxu1 %vm728_vm6, %v721_v17 }
 0x208   :  { %v798_v21 = vpop.f32.mrb[6].mxu0 }
 0x209   :  { %v799_v22 = vadd.f32 %v798_v21, %v726_v20  ;;  %v800_v24 = vpop.f32.mrb[7].mxu0 }
 0x20a   :  { %v801_v26 = vadd.f32 %v800_v24, %v726_v20 }
 0x20b   :  { %v869_v23 = vpop.f32.mrb[6].mxu1 }
 0x20c   :  { %v870_v27 = vadd.f32 %v869_v23, %v726_v20  ;;  %v876_v18 = vcombine.low %v799_v22, %v801_v26  ;;  %v871_v28 = vpop.f32.mrb[7].mxu1 }
 0x20d   :  { %v872_v29 = vadd.f32 %v871_v28, %v726_v20 }
 0x20e   :  { %878 = vst [vmem:[%s1747_s8] sm:$0xff] %v876_v18 }
 0x20f   :  { %v881_v31 = vcombine.low %v870_v27, %v872_v29 }
 0x211   :  { %961 = vst [vmem:[%s1747_s8 + $0x8] sm:$0xff] %v881_v31 }

</bundles_post_ra>
